<compile_context>
chip_gen: v6e
topology: v6e:2x2x1
jax: 0.10.0
libtpu: 0.0.40
codegen_flags: <defaults>
</compile_context>

<pallas_src>
import functools
import math

import jax
import jax.numpy as jnp
import numpy as np
from jax.experimental import pallas as pl
from jax.experimental.pallas import tpu as pltpu


def _discrete_attention_kernel(x_ref, theta0_ref, pi0_ref, gumbel_ref, out_ref,
                               *, num_iter, epsilon, temperature, use_bf16_matmul):
    x = x_ref[...].astype(jnp.float32)                # (Bt, N, D)
    Bt, N, D = x.shape
    K = theta0_ref.shape[1]

    mxu_dtype = jnp.bfloat16 if use_bf16_matmul else jnp.float32

    # log_softmax(inputs) is iteration-invariant -> hoist out of the EM loop.
    x_max = jnp.max(x, axis=-1, keepdims=True)
    xs = x - x_max
    log_p = xs - jnp.log(jnp.sum(jnp.exp(xs), axis=-1, keepdims=True))   # (Bt, N, D)

    x_mxu = x.astype(mxu_dtype)
    log_p_mxu = log_p.astype(mxu_dtype)
    inv_n = jnp.float32(1.0 / N)

    def em_step(_, carry):
        theta, pi = carry                              # (Bt,K,D), (Bt,1,K)

        # q = softmax(theta, dim=-1); divide -> EUP approx reciprocal (free slot).
        t_max = jnp.max(theta, axis=-1, keepdims=True)
        e_t = jnp.exp(theta - t_max)
        q = e_t * pl.reciprocal(jnp.sum(e_t, axis=-1, keepdims=True), approx=True)

        # logits = log_p @ q^T + log(pi + eps): contract over D; the transpose is
        # folded into the contraction (no materialized (K,D)->(D,K) per iteration).
        logits = jax.lax.dot_general(
            log_p_mxu, q.astype(mxu_dtype),
            dimension_numbers=(((2,), (2,)), ((0,), (0,))),
            preferred_element_type=jnp.float32)        # (Bt, N, K)
        logits = logits + jnp.log(pi + epsilon)

        # gamma = softmax(logits, dim=-1)
        l_max = jnp.max(logits, axis=-1, keepdims=True)
        e_l = jnp.exp(logits - l_max)
        gamma = e_l * pl.reciprocal(jnp.sum(e_l, axis=-1, keepdims=True), approx=True)

        # Single column-sum over N feeds both pi (mean) and gamma_sum (sum).
        col = jnp.sum(gamma, axis=1)                   # (Bt, K)
        new_pi = (col * inv_n)[:, None, :]             # (Bt, 1, K)

        # numerator = gamma^T @ x: contract over N, no (N,K)->(K,N) transpose.
        numerator = jax.lax.dot_general(
            gamma.astype(mxu_dtype), x_mxu,
            dimension_numbers=(((1,), (1,)), ((0,), (0,))),
            preferred_element_type=jnp.float32)        # (Bt, K, D)

        inv_gamma_sum = pl.reciprocal(col + epsilon, approx=True)[:, :, None]  # (Bt,K,1)
        new_theta = numerator * inv_gamma_sum
        return new_theta, new_pi

    theta0 = jnp.broadcast_to(theta0_ref[...].astype(jnp.float32), (Bt, K, D))
    pi0 = jnp.broadcast_to(pi0_ref[...].astype(jnp.float32)[:, None, :], (Bt, 1, K))
    theta, _ = jax.lax.fori_loop(0, num_iter, em_step, (theta0, pi0),
                                 unroll=bool(num_iter <= 4))

    # Gumbel-softmax (soft, hard=False): softmax((theta + g) / tau, dim=-1).
    # The Gumbel(0,1) noise is drawn outside the kernel and passed in.
    y = (theta + gumbel_ref[...].astype(jnp.float32)) * jnp.float32(1.0 / temperature)
    y_max = jnp.max(y, axis=-1, keepdims=True)
    e_y = jnp.exp(y - y_max)
    out = e_y * pl.reciprocal(jnp.sum(e_y, axis=-1, keepdims=True), approx=True)
    # TODO(synk): for production shapes with D < 128, store a lane-dense (Bt, K*D)
    # slab (and N-chunk the EM accumulation for v7x's 64 MiB VMEM at large N*D).
    out_ref[...] = out.astype(out_ref.dtype)


def discrete_attention(inputs, slot_logits, mixing_coefficients, gumbel_noise,
                       *, num_iter, epsilon=1e-8, temperature=1.0,
                       block_b=None, use_bf16_matmul=False):
    B, N, D = inputs.shape
    _, K, _ = slot_logits.shape

    if block_b is None:
        # Whole batch in one grid step when small, else largest divisor <= 8.
        block_b = B if B <= 8 else next(bb for bb in (8, 4, 2, 1) if B % bb == 0)
    assert B % block_b == 0, "block_b must divide the batch size"

    kernel = functools.partial(
        _discrete_attention_kernel,
        num_iter=num_iter, epsilon=epsilon, temperature=temperature,
        use_bf16_matmul=use_bf16_matmul)

    return pl.pallas_call(
        kernel,
        out_shape=jax.ShapeDtypeStruct((B, K, D), inputs.dtype),
        grid=(B // block_b,),
        in_specs=[
            pl.BlockSpec((block_b, N, D), lambda b: (b, 0, 0)),  # inputs (per-block)
            pl.BlockSpec((1, K, D), lambda b: (0, 0, 0)),        # slot_logits (shared)
            pl.BlockSpec((1, K), lambda b: (0, 0)),              # mixing coeff (shared)
            pl.BlockSpec((block_b, K, D), lambda b: (b, 0, 0)),  # gumbel noise (per-block)
        ],
        out_specs=pl.BlockSpec((block_b, K, D), lambda b: (b, 0, 0)),
        compiler_params=pltpu.CompilerParams(
            dimension_semantics=("parallel",),        # batch is independent -> megacore
            vmem_limit_bytes=32 * 1024 * 1024),       # explicit (v5e default is 16 MiB)
    )(inputs, slot_logits, mixing_coefficients, gumbel_noise)


def _reference(inputs, slot_logits, mixing, gumbel, num_iter, eps, tau):
    """Pure-JAX mirror of the PyTorch forward (same gumbel noise)."""
    B, N, D = inputs.shape
    K = slot_logits.shape[1]
    theta = jnp.broadcast_to(slot_logits, (B, K, D))
    pi = jnp.broadcast_to(mixing, (B, K))
    for _ in range(num_iter):
        log_p = jax.nn.log_softmax(inputs, axis=-1)
        q = jax.nn.softmax(theta, axis=-1)
        logits = jnp.einsum('bnd,bkd->bnk', log_p, q) + jnp.log(pi + eps)[:, None, :]
        gamma = jax.nn.softmax(logits, axis=-1)
        pi = gamma.mean(axis=1)
        gamma_sum = gamma.sum(axis=1) + eps
        numerator = jnp.einsum('bnk,bnd->bkd', gamma, inputs)
        theta = numerator / gamma_sum[..., None]
    return jax.nn.softmax((theta + gumbel) / tau, axis=-1)


if __name__ == "__main__":
    B, N, D, K = 2, 8, 32, 4          # batch, seq, input_size, num_slots
    num_iter = 3
    epsilon = 1e-8
    temperature = 1.0

    key = jax.random.PRNGKey(0)
    k_in, k_theta, k_gumbel = jax.random.split(key, 3)

    inputs = jax.random.normal(k_in, (B, N, D), jnp.float32)

    # xavier_uniform on a (1, K, D) tensor: fan_in = K*D, fan_out = 1*D
    bound = math.sqrt(6.0 / (K * D + 1 * D))
    slot_logits = jax.random.uniform(k_theta, (1, K, D), jnp.float32, -bound, bound)
    mixing_coefficients = jnp.full((1, K), 1.0 / K, jnp.float32)

    # Gumbel(0,1) noise for F.gumbel_softmax (RNG draw kept outside the kernel).
    gumbel_noise = jax.random.gumbel(k_gumbel, (B, K, D), jnp.float32)

    slots = discrete_attention(
        inputs, slot_logits, mixing_coefficients, gumbel_noise,
        num_iter=num_iter, epsilon=epsilon, temperature=temperature)
    slots = jax.block_until_ready(slots)

    ref = _reference(inputs, slot_logits, mixing_coefficients, gumbel_noise,
                     num_iter, epsilon, temperature)

    assert slots.shape == (B, K, D)
    # Each slot distribution sums to ~1 (EUP approx reciprocal -> tiny deviation).
    np.testing.assert_allclose(np.asarray(slots.sum(-1)), np.ones((B, K)), atol=5e-3)
    # Loosened vs exact-divide: absorbs approx-reciprocal error compounded over
    # num_iter EM iterations (the pure-JAX reference uses exact divides).
    np.testing.assert_allclose(np.asarray(slots), np.asarray(ref), atol=5e-3, rtol=5e-3)

    print("KERNEL_OK")
</pallas_src>

<mosaic_0001>
module attributes {stable_mosaic.version = 11 : i64} {
  func.func @_discrete_attention_kernel(%arg0: i32, %arg1: memref<2x8x32xf32, #tpu.memory_space<vmem>>, %arg2: memref<1x4x32xf32, #tpu.memory_space<vmem>>, %arg3: memref<1x4xf32, #tpu.memory_space<vmem>>, %arg4: memref<2x4x32xf32, #tpu.memory_space<vmem>>, %arg5: memref<2x4x32xf32, #tpu.memory_space<vmem>>) attributes {dimension_semantics = [#tpu.dimension_semantics<parallel>], iteration_bounds = array<i64: 1>, scalar_prefetch = 0 : i64, scratch_operands = 0 : i64, tpu.core_type = #tpu.core_type<tc>, window_params = [{transform_indices = @transform_0, window_bounds = array<i64: 2, 8, 32>}, {pipeline_mode = #tpu.pipeline_mode<synchronous>, transform_indices = @transform_1, window_bounds = array<i64: 1, 4, 32>}, {pipeline_mode = #tpu.pipeline_mode<synchronous>, transform_indices = @transform_2, window_bounds = array<i64: 1, 4>}, {transform_indices = @transform_3, window_bounds = array<i64: 2, 4, 32>}, {transform_indices = @transform_4, window_bounds = array<i64: 2, 4, 32>}]} {
    %c0 = arith.constant 0 : index
    %c0_0 = arith.constant 0 : index
    %c0_1 = arith.constant 0 : index
    %0 = vector.load %arg1[%c0, %c0_0, %c0_1] : memref<2x8x32xf32, #tpu.memory_space<vmem>>, vector<2x8x32xf32>
    %cst = arith.constant dense<0xFF800000> : vector<2x8xf32>
    %1 = vector.multi_reduction <maximumf>, %0, %cst [2] : vector<2x8x32xf32> to vector<2x8xf32>
    %2 = vector.shape_cast %1 : vector<2x8xf32> to vector<2x8x1xf32>
    %3 = vector.broadcast %2 : vector<2x8x1xf32> to vector<2x8x32xf32>
    %4 = arith.subf %0, %3 : vector<2x8x32xf32>
    %5 = math.exp %4 : vector<2x8x32xf32>
    %cst_2 = arith.constant dense<0.000000e+00> : vector<2x8xf32>
    %6 = vector.multi_reduction <add>, %5, %cst_2 [2] : vector<2x8x32xf32> to vector<2x8xf32>
    %7 = vector.shape_cast %6 : vector<2x8xf32> to vector<2x8x1xf32>
    %8 = math.log %7 : vector<2x8x1xf32>
    %9 = vector.broadcast %8 : vector<2x8x1xf32> to vector<2x8x32xf32>
    %10 = arith.subf %4, %9 : vector<2x8x32xf32>
    %c0_3 = arith.constant 0 : index
    %c0_4 = arith.constant 0 : index
    %c0_5 = arith.constant 0 : index
    %11 = vector.load %arg2[%c0_3, %c0_4, %c0_5] : memref<1x4x32xf32, #tpu.memory_space<vmem>>, vector<1x4x32xf32>
    %12 = vector.shape_cast %11 : vector<1x4x32xf32> to vector<1x4x32xf32>
    %13 = vector.broadcast %12 : vector<1x4x32xf32> to vector<2x4x32xf32>
    %c0_6 = arith.constant 0 : index
    %c0_7 = arith.constant 0 : index
    %14 = vector.load %arg3[%c0_6, %c0_7] : memref<1x4xf32, #tpu.memory_space<vmem>>, vector<1x4xf32>
    %15 = vector.shape_cast %14 : vector<1x4xf32> to vector<1x1x4xf32>
    %16 = vector.shape_cast %15 : vector<1x1x4xf32> to vector<1x1x4xf32>
    %17 = vector.broadcast %16 : vector<1x1x4xf32> to vector<2x1x4xf32>
    %cst_8 = arith.constant 1.250000e-01 : f32
    %c0_i32 = arith.constant 0 : i32
    %cst_9 = arith.constant dense<0xFF800000> : vector<2x4xf32>
    %18 = vector.multi_reduction <maximumf>, %13, %cst_9 [2] : vector<2x4x32xf32> to vector<2x4xf32>
    %19 = vector.shape_cast %18 : vector<2x4xf32> to vector<2x4x1xf32>
    %20 = vector.broadcast %19 : vector<2x4x1xf32> to vector<2x4x32xf32>
    %21 = arith.subf %13, %20 : vector<2x4x32xf32>
    %22 = math.exp %21 : vector<2x4x32xf32>
    %cst_10 = arith.constant dense<0.000000e+00> : vector<2x4xf32>
    %23 = vector.multi_reduction <add>, %22, %cst_10 [2] : vector<2x4x32xf32> to vector<2x4xf32>
    %24 = vector.shape_cast %23 : vector<2x4xf32> to vector<2x4x1xf32>
    %25 = tpu.reciprocal %24 {approx = true} : vector<2x4x1xf32> -> vector<2x4x1xf32>
    %26 = vector.broadcast %25 : vector<2x4x1xf32> to vector<2x4x32xf32>
    %27 = arith.mulf %22, %26 : vector<2x4x32xf32>
    %cst_11 = arith.constant dense<0.000000e+00> : vector<2x8x4xf32>
    %28 = tpu.matmul %10, %27, %cst_11 {dimension_numbers = #tpu.dot_dimension_numbers<[2], [2], [1], [1], [0, 0, 0, 1, 1, 1], [0], [0]>} : vector<2x8x32xf32>, vector<2x4x32xf32>, vector<2x8x4xf32> -> vector<2x8x4xf32>
    %cst_12 = arith.constant 9.99999993E-9 : f32
    %29 = vector.broadcast %cst_12 : f32 to vector<2x1x4xf32>
    %30 = arith.addf %17, %29 : vector<2x1x4xf32>
    %31 = math.log %30 : vector<2x1x4xf32>
    %32 = vector.broadcast %31 : vector<2x1x4xf32> to vector<2x8x4xf32>
    %33 = arith.addf %28, %32 : vector<2x8x4xf32>
    %cst_13 = arith.constant dense<0xFF800000> : vector<2x8xf32>
    %34 = vector.multi_reduction <maximumf>, %33, %cst_13 [2] : vector<2x8x4xf32> to vector<2x8xf32>
    %35 = vector.shape_cast %34 : vector<2x8xf32> to vector<2x8x1xf32>
    %36 = vector.broadcast %35 : vector<2x8x1xf32> to vector<2x8x4xf32>
    %37 = arith.subf %33, %36 : vector<2x8x4xf32>
    %38 = math.exp %37 : vector<2x8x4xf32>
    %cst_14 = arith.constant dense<0.000000e+00> : vector<2x8xf32>
    %39 = vector.multi_reduction <add>, %38, %cst_14 [2] : vector<2x8x4xf32> to vector<2x8xf32>
    %40 = vector.shape_cast %39 : vector<2x8xf32> to vector<2x8x1xf32>
    %41 = tpu.reciprocal %40 {approx = true} : vector<2x8x1xf32> -> vector<2x8x1xf32>
    %42 = vector.broadcast %41 : vector<2x8x1xf32> to vector<2x8x4xf32>
    %43 = arith.mulf %38, %42 : vector<2x8x4xf32>
    %cst_15 = arith.constant dense<0.000000e+00> : vector<2x4xf32>
    %44 = vector.multi_reduction <add>, %43, %cst_15 [1] : vector<2x8x4xf32> to vector<2x4xf32>
    %45 = vector.broadcast %cst_8 : f32 to vector<2x4xf32>
    %46 = arith.mulf %44, %45 : vector<2x4xf32>
    %47 = vector.shape_cast %46 : vector<2x4xf32> to vector<2x1x4xf32>
    %cst_16 = arith.constant dense<0.000000e+00> : vector<2x4x32xf32>
    %48 = tpu.matmul %43, %0, %cst_16 {dimension_numbers = #tpu.dot_dimension_numbers<[1], [1], [2], [2], [0, 0, 0, 2, 1, 2], [0], [0]>} : vector<2x8x4xf32>, vector<2x8x32xf32>, vector<2x4x32xf32> -> vector<2x4x32xf32>
    %cst_17 = arith.constant 9.99999993E-9 : f32
    %49 = vector.broadcast %cst_17 : f32 to vector<2x4xf32>
    %50 = arith.addf %44, %49 : vector<2x4xf32>
    %51 = tpu.reciprocal %50 {approx = true} : vector<2x4xf32> -> vector<2x4xf32>
    %52 = vector.shape_cast %51 : vector<2x4xf32> to vector<2x4x1xf32>
    %53 = vector.broadcast %52 : vector<2x4x1xf32> to vector<2x4x32xf32>
    %54 = arith.mulf %48, %53 : vector<2x4x32xf32>
    %c1_i32 = arith.constant 1 : i32
    %cst_18 = arith.constant dense<0xFF800000> : vector<2x4xf32>
    %55 = vector.multi_reduction <maximumf>, %54, %cst_18 [2] : vector<2x4x32xf32> to vector<2x4xf32>
    %56 = vector.shape_cast %55 : vector<2x4xf32> to vector<2x4x1xf32>
    %57 = vector.broadcast %56 : vector<2x4x1xf32> to vector<2x4x32xf32>
    %58 = arith.subf %54, %57 : vector<2x4x32xf32>
    %59 = math.exp %58 : vector<2x4x32xf32>
    %cst_19 = arith.constant dense<0.000000e+00> : vector<2x4xf32>
    %60 = vector.multi_reduction <add>, %59, %cst_19 [2] : vector<2x4x32xf32> to vector<2x4xf32>
    %61 = vector.shape_cast %60 : vector<2x4xf32> to vector<2x4x1xf32>
    %62 = tpu.reciprocal %61 {approx = true} : vector<2x4x1xf32> -> vector<2x4x1xf32>
    %63 = vector.broadcast %62 : vector<2x4x1xf32> to vector<2x4x32xf32>
    %64 = arith.mulf %59, %63 : vector<2x4x32xf32>
    %cst_20 = arith.constant dense<0.000000e+00> : vector<2x8x4xf32>
    %65 = tpu.matmul %10, %64, %cst_20 {dimension_numbers = #tpu.dot_dimension_numbers<[2], [2], [1], [1], [0, 0, 0, 1, 1, 1], [0], [0]>} : vector<2x8x32xf32>, vector<2x4x32xf32>, vector<2x8x4xf32> -> vector<2x8x4xf32>
    %cst_21 = arith.constant 9.99999993E-9 : f32
    %66 = vector.broadcast %cst_21 : f32 to vector<2x1x4xf32>
    %67 = arith.addf %47, %66 : vector<2x1x4xf32>
    %68 = math.log %67 : vector<2x1x4xf32>
    %69 = vector.broadcast %68 : vector<2x1x4xf32> to vector<2x8x4xf32>
    %70 = arith.addf %65, %69 : vector<2x8x4xf32>
    %cst_22 = arith.constant dense<0xFF800000> : vector<2x8xf32>
    %71 = vector.multi_reduction <maximumf>, %70, %cst_22 [2] : vector<2x8x4xf32> to vector<2x8xf32>
    %72 = vector.shape_cast %71 : vector<2x8xf32> to vector<2x8x1xf32>
    %73 = vector.broadcast %72 : vector<2x8x1xf32> to vector<2x8x4xf32>
    %74 = arith.subf %70, %73 : vector<2x8x4xf32>
    %75 = math.exp %74 : vector<2x8x4xf32>
    %cst_23 = arith.constant dense<0.000000e+00> : vector<2x8xf32>
    %76 = vector.multi_reduction <add>, %75, %cst_23 [2] : vector<2x8x4xf32> to vector<2x8xf32>
    %77 = vector.shape_cast %76 : vector<2x8xf32> to vector<2x8x1xf32>
    %78 = tpu.reciprocal %77 {approx = true} : vector<2x8x1xf32> -> vector<2x8x1xf32>
    %79 = vector.broadcast %78 : vector<2x8x1xf32> to vector<2x8x4xf32>
    %80 = arith.mulf %75, %79 : vector<2x8x4xf32>
    %cst_24 = arith.constant dense<0.000000e+00> : vector<2x4xf32>
    %81 = vector.multi_reduction <add>, %80, %cst_24 [1] : vector<2x8x4xf32> to vector<2x4xf32>
    %82 = vector.broadcast %cst_8 : f32 to vector<2x4xf32>
    %83 = arith.mulf %81, %82 : vector<2x4xf32>
    %84 = vector.shape_cast %83 : vector<2x4xf32> to vector<2x1x4xf32>
    %cst_25 = arith.constant dense<0.000000e+00> : vector<2x4x32xf32>
    %85 = tpu.matmul %80, %0, %cst_25 {dimension_numbers = #tpu.dot_dimension_numbers<[1], [1], [2], [2], [0, 0, 0, 2, 1, 2], [0], [0]>} : vector<2x8x4xf32>, vector<2x8x32xf32>, vector<2x4x32xf32> -> vector<2x4x32xf32>
    %cst_26 = arith.constant 9.99999993E-9 : f32
    %86 = vector.broadcast %cst_26 : f32 to vector<2x4xf32>
    %87 = arith.addf %81, %86 : vector<2x4xf32>
    %88 = tpu.reciprocal %87 {approx = true} : vector<2x4xf32> -> vector<2x4xf32>
    %89 = vector.shape_cast %88 : vector<2x4xf32> to vector<2x4x1xf32>
    %90 = vector.broadcast %89 : vector<2x4x1xf32> to vector<2x4x32xf32>
    %91 = arith.mulf %85, %90 : vector<2x4x32xf32>
    %c2_i32 = arith.constant 2 : i32
    %cst_27 = arith.constant dense<0xFF800000> : vector<2x4xf32>
    %92 = vector.multi_reduction <maximumf>, %91, %cst_27 [2] : vector<2x4x32xf32> to vector<2x4xf32>
    %93 = vector.shape_cast %92 : vector<2x4xf32> to vector<2x4x1xf32>
    %94 = vector.broadcast %93 : vector<2x4x1xf32> to vector<2x4x32xf32>
    %95 = arith.subf %91, %94 : vector<2x4x32xf32>
    %96 = math.exp %95 : vector<2x4x32xf32>
    %cst_28 = arith.constant dense<0.000000e+00> : vector<2x4xf32>
    %97 = vector.multi_reduction <add>, %96, %cst_28 [2] : vector<2x4x32xf32> to vector<2x4xf32>
    %98 = vector.shape_cast %97 : vector<2x4xf32> to vector<2x4x1xf32>
    %99 = tpu.reciprocal %98 {approx = true} : vector<2x4x1xf32> -> vector<2x4x1xf32>
    %100 = vector.broadcast %99 : vector<2x4x1xf32> to vector<2x4x32xf32>
    %101 = arith.mulf %96, %100 : vector<2x4x32xf32>
    %cst_29 = arith.constant dense<0.000000e+00> : vector<2x8x4xf32>
    %102 = tpu.matmul %10, %101, %cst_29 {dimension_numbers = #tpu.dot_dimension_numbers<[2], [2], [1], [1], [0, 0, 0, 1, 1, 1], [0], [0]>} : vector<2x8x32xf32>, vector<2x4x32xf32>, vector<2x8x4xf32> -> vector<2x8x4xf32>
    %cst_30 = arith.constant 9.99999993E-9 : f32
    %103 = vector.broadcast %cst_30 : f32 to vector<2x1x4xf32>
    %104 = arith.addf %84, %103 : vector<2x1x4xf32>
    %105 = math.log %104 : vector<2x1x4xf32>
    %106 = vector.broadcast %105 : vector<2x1x4xf32> to vector<2x8x4xf32>
    %107 = arith.addf %102, %106 : vector<2x8x4xf32>
    %cst_31 = arith.constant dense<0xFF800000> : vector<2x8xf32>
    %108 = vector.multi_reduction <maximumf>, %107, %cst_31 [2] : vector<2x8x4xf32> to vector<2x8xf32>
    %109 = vector.shape_cast %108 : vector<2x8xf32> to vector<2x8x1xf32>
    %110 = vector.broadcast %109 : vector<2x8x1xf32> to vector<2x8x4xf32>
    %111 = arith.subf %107, %110 : vector<2x8x4xf32>
    %112 = math.exp %111 : vector<2x8x4xf32>
    %cst_32 = arith.constant dense<0.000000e+00> : vector<2x8xf32>
    %113 = vector.multi_reduction <add>, %112, %cst_32 [2] : vector<2x8x4xf32> to vector<2x8xf32>
    %114 = vector.shape_cast %113 : vector<2x8xf32> to vector<2x8x1xf32>
    %115 = tpu.reciprocal %114 {approx = true} : vector<2x8x1xf32> -> vector<2x8x1xf32>
    %116 = vector.broadcast %115 : vector<2x8x1xf32> to vector<2x8x4xf32>
    %117 = arith.mulf %112, %116 : vector<2x8x4xf32>
    %cst_33 = arith.constant dense<0.000000e+00> : vector<2x4xf32>
    %118 = vector.multi_reduction <add>, %117, %cst_33 [1] : vector<2x8x4xf32> to vector<2x4xf32>
    %119 = vector.broadcast %cst_8 : f32 to vector<2x4xf32>
    %120 = arith.mulf %118, %119 : vector<2x4xf32>
    %121 = vector.shape_cast %120 : vector<2x4xf32> to vector<2x1x4xf32>
    %cst_34 = arith.constant dense<0.000000e+00> : vector<2x4x32xf32>
    %122 = tpu.matmul %117, %0, %cst_34 {dimension_numbers = #tpu.dot_dimension_numbers<[1], [1], [2], [2], [0, 0, 0, 2, 1, 2], [0], [0]>} : vector<2x8x4xf32>, vector<2x8x32xf32>, vector<2x4x32xf32> -> vector<2x4x32xf32>
    %cst_35 = arith.constant 9.99999993E-9 : f32
    %123 = vector.broadcast %cst_35 : f32 to vector<2x4xf32>
    %124 = arith.addf %118, %123 : vector<2x4xf32>
    %125 = tpu.reciprocal %124 {approx = true} : vector<2x4xf32> -> vector<2x4xf32>
    %126 = vector.shape_cast %125 : vector<2x4xf32> to vector<2x4x1xf32>
    %127 = vector.broadcast %126 : vector<2x4x1xf32> to vector<2x4x32xf32>
    %128 = arith.mulf %122, %127 : vector<2x4x32xf32>
    %c0_36 = arith.constant 0 : index
    %c0_37 = arith.constant 0 : index
    %c0_38 = arith.constant 0 : index
    %129 = vector.load %arg4[%c0_36, %c0_37, %c0_38] : memref<2x4x32xf32, #tpu.memory_space<vmem>>, vector<2x4x32xf32>
    %130 = arith.addf %128, %129 : vector<2x4x32xf32>
    %cst_39 = arith.constant 1.000000e+00 : f32
    %131 = vector.broadcast %cst_39 : f32 to vector<2x4x32xf32>
    %132 = arith.mulf %130, %131 : vector<2x4x32xf32>
    %cst_40 = arith.constant dense<0xFF800000> : vector<2x4xf32>
    %133 = vector.multi_reduction <maximumf>, %132, %cst_40 [2] : vector<2x4x32xf32> to vector<2x4xf32>
    %134 = vector.shape_cast %133 : vector<2x4xf32> to vector<2x4x1xf32>
    %135 = vector.broadcast %134 : vector<2x4x1xf32> to vector<2x4x32xf32>
    %136 = arith.subf %132, %135 : vector<2x4x32xf32>
    %137 = math.exp %136 : vector<2x4x32xf32>
    %cst_41 = arith.constant dense<0.000000e+00> : vector<2x4xf32>
    %138 = vector.multi_reduction <add>, %137, %cst_41 [2] : vector<2x4x32xf32> to vector<2x4xf32>
    %139 = vector.shape_cast %138 : vector<2x4xf32> to vector<2x4x1xf32>
    %140 = tpu.reciprocal %139 {approx = true} : vector<2x4x1xf32> -> vector<2x4x1xf32>
    %141 = vector.broadcast %140 : vector<2x4x1xf32> to vector<2x4x32xf32>
    %142 = arith.mulf %137, %141 : vector<2x4x32xf32>
    %c0_42 = arith.constant 0 : index
    %c0_43 = arith.constant 0 : index
    %c0_44 = arith.constant 0 : index
    %143 = vector.load %arg5[%c0_42, %c0_43, %c0_44] : memref<2x4x32xf32, #tpu.memory_space<vmem>>, vector<2x4x32xf32>
    tpu.vector_store %arg5[%c0_42, %c0_43, %c0_44], %142 {strides = array<i32>} : memref<2x4x32xf32, #tpu.memory_space<vmem>>, vector<2x4x32xf32>,
    return
  }
  func.func @transform_0(%arg0: i32) -> (i32, i32, i32) {
    %c0_i32 = arith.constant 0 : i32
    %c0_i32_0 = arith.constant 0 : i32
    %c0_i32_1 = arith.constant 0 : i32
    return %arg0, %c0_i32, %c0_i32_0 : i32, i32, i32
  }
  func.func @transform_1(%arg0: i32) -> (i32, i32, i32) {
    %c0_i32 = arith.constant 0 : i32
    %c0_i32_0 = arith.constant 0 : i32
    %c0_i32_1 = arith.constant 0 : i32
    %c0_i32_2 = arith.constant 0 : i32
    return %c0_i32, %c0_i32_0, %c0_i32_1 : i32, i32, i32
  }
  func.func @transform_2(%arg0: i32) -> (i32, i32) {
    %c0_i32 = arith.constant 0 : i32
    %c0_i32_0 = arith.constant 0 : i32
    %c0_i32_1 = arith.constant 0 : i32
    return %c0_i32, %c0_i32_0 : i32, i32
  }
  func.func @transform_3(%arg0: i32) -> (i32, i32, i32) {
    %c0_i32 = arith.constant 0 : i32
    %c0_i32_0 = arith.constant 0 : i32
    %c0_i32_1 = arith.constant 0 : i32
    return %arg0, %c0_i32, %c0_i32_0 : i32, i32, i32
  }
  func.func @transform_4(%arg0: i32) -> (i32, i32, i32) {
    %c0_i32 = arith.constant 0 : i32
    %c0_i32_0 = arith.constant 0 : i32
    %c0_i32_1 = arith.constant 0 : i32
    return %arg0, %c0_i32, %c0_i32_0 : i32, i32, i32
  }
}

</mosaic_0001>

<bundles_post_ra>
// kernel: tpu_custom_call.1
= control target key start
LH: loop header
LB: loop body
LE: loop exit
PB: predicated region body
PF: predicated region fallthrough
CT: control target
= control target key end

     0   :  { %9 = vsyncpa [#allocation3], 0  ;;  %s1886_s0 = inlined_call_operand.hbm [shape: f32[2,8,32], index: 0, kind: input, shape index: {}]   ;;  %s1887_s1 = inlined_call_operand.hbm [shape: f32[1,4,32], index: 1, kind: input, shape index: {}]   ;;  %s1888_s2 = inlined_call_operand.vmem [shape: f32[1,4], index: 2, kind: input, shape index: {}]   ;;  %s1889_s3 = inlined_call_operand.hbm [shape: f32[2,4,32], index: 3, kind: input, shape index: {}]   ;;  %s1890_s4 = inlined_call_operand.hbm [shape: f32[2,4,32], index: 4, kind: output, shape index: {}]  }
   0x1   :  { %10 = vsyncpa [#allocation6], 0 }
   0x2   :  { %11 = vsyncpa [#allocation4], 0  ;;  %s1710_s15 = smov [#allocation5]   ;;  %s1711_s17 = smov [#allocation2]  }
   0x3   :  { %s30_s16 = sshll.u32 %s1710_s15, 4  ;;  %s17_s18 = sshll.u32 %s1711_s17, 4  ;;  %s31_s16 = int_to_ptr.vmem [resolvable:$true] %s30_s16  ;;  %s18_s18 = int_to_ptr.vmem [resolvable:$true] %s17_s18 }
   0x4   :  { %s1632_s19 = scalar_lea.vmem %s31_s16, 64  ;;  %p1637_p1 = scmp.lt.s32.totalorder %s31_s16, %s31_s16 }
   0x5   :  { %p1633_p0 = scmp.ne.s32.totalorder %s31_s16, %s1632_s19  ;;  %p1638_p2 = scmp.lt.s32.totalorder %s1632_s19, %s1632_s19 }
   0x7   :  { %p1639_p3 = por %p1638_p2, %p1637_p1 }
   0x9   :  { %p1640_p4 = pnand %p1639_p3, %p1633_p0 }
   0xb   :  { %1643 = shalt.err (!%p1640_p4)
}
   0xc   :  { %33 = dma.hbm_to_vmem [thread:$0]  %s1887_s1, 64, %s31_s16, [#allocation6]  }
   0xd   :  { %s1652_s22 = scalar_lea.vmem %s18_s18, 256  ;;  %p1657_p6 = scmp.lt.s32.totalorder %s18_s18, %s18_s18 }
   0xe   :  { %p1653_p5 = scmp.ne.s32.totalorder %s18_s18, %s1652_s22  ;;  %p1658_p7 = scmp.lt.s32.totalorder %s1652_s22, %s1652_s22 }
  0x10   :  { %p1659_p8 = por %p1658_p7, %p1657_p6 }
  0x12   :  { %p1660_p9 = pnand %p1659_p8, %p1653_p5 }
  0x14   :  { %1663 = shalt.err (!%p1660_p9)
}
  0x15   :  { %s1712_s23 = smov 128   ;;  %s1713_s24 = smov 8  }
  0x16   :  { %23 = dma.hbm_to_vmem [thread:$0]  %s1886_s0, 256, %s18_s18, [#allocation3], %s1712_s23, %s1712_s23, %s1713_s24  }
  0x17   :  { %s1714_s27 = smov [#allocation7]  }
  0x18   :  { %s41_s28 = sshll.u32 %s1714_s27, 4  ;;  %s42_s28 = int_to_ptr.vmem [resolvable:$true] %s41_s28 }
  0x19   :  { %s1672_s29 = scalar_lea.vmem %s42_s28, 128  ;;  %p1677_p11 = scmp.lt.s32.totalorder %s42_s28, %s42_s28 }
  0x1a   :  { %p1673_p10 = scmp.ne.s32.totalorder %s42_s28, %s1672_s29  ;;  %p1678_p12 = scmp.lt.s32.totalorder %s1672_s29, %s1672_s29 }
  0x1c   :  { %p1679_p13 = por %p1678_p12, %p1677_p11 }
  0x1e   :  { %p1680_p0 = pnand %p1679_p13, %p1673_p10 }
  0x20   :  { %1683 = shalt.err (!%p1680_p0)
}
  0x21   :  { %s1715_s1 = smov 64   ;;  %s1716_s30 = smov 4  }
  0x22   :  { %47 = dma.hbm_to_vmem [thread:$0]  %s1889_s3, 128, %s42_s28, [#allocation6], %s1715_s1, %s1715_s1, %s1716_s30  }
  0x23   :  { %1704 = dma.done.wait [#allocation3], 256  }
  0x24   :  { %1705 = vsyncadd [#allocation3], 4294967040 }
  0x25   :  { %1706 = dma.done.wait [#allocation6], 192  }
  0x26   :  { %1707 = vsyncadd [#allocation6], 4294967104  ;;  %vm86_vm0 = vcmask 257024   ;;  %vm59_vm1 = vcmask 261120   ;;  %v84_v0 = vld [vmem:[#allocation5] sm:$0xf]  ;;  %v102_v35 = vlaneseq }
  0x27   :  { %v1757_v1 = vld [vmem:[#allocation2 + $0x8] sm:$0xff]  ;;  %v1759_v2 = vld [vmem:[#allocation2] sm:$0xff]  ;;  %v87_v3 = vsel %vm86_vm0, %v84_v0, -inf  ;;  %v1717_v21 = vmov 0.0   ;;  %vm1718_vm2 = vmmov 0   ;;  %vm256_vm3 = vcmask 31744  }
  0x28   :  { %v63_v4 = vsel %vm59_vm1, %v1757_v1, -inf  ;;  %88 = vmax.xlane.f32.xlu0 %v87_v3  ;;  %v60_v5 = vsel %vm59_vm1, %v1759_v2, -inf  ;;  %1472 = vmatprep.subr.mxu0 %v1717_v21  ;;  %v85_v33 = vld [vmem:[%s1888_s2] sm:$0x1]  ;;  %v103_v36 = vshrl.u32 %v102_v35, 7  ;;  %vm327_vm4 = vcmask 64512  }
  0x29   :  { %64 = vmax.xlane.f32.xlu1 %v63_v4  ;;  %1477 = vmatprep.subr.mxu1 %v1717_v21  ;;  %v98_v34 = vadd.f32 1e-08, %v85_v33  ;;  %s1719_s2 = smov [#allocation8]  }
  0x2a   :  { %1474 = vmatprep.mubr.msk.f32.mxu0 %vm1718_vm2, %v1717_v21  ;;  %1479 = vmatprep.mubr.msk.f32.mxu1 %vm1718_vm2, %v1717_v21  ;;  %v104_v39 = vsub.s32 0, %v103_v36  ;;  %s1417_s7 = sshll.u32 %s1719_s2, 4  ;;  %s1418_s7 = int_to_ptr.vmem [resolvable:$true] %s1417_s7 }
  0x2b   :  { %s1684_s8 = scalar_lea.vmem %s1418_s7, 128  ;;  %p1689_p2 = scmp.lt.s32.totalorder %s1418_s7, %s1418_s7 }
  0x2c   :  { %61 = vmax.xlane.f32.xlu0 %v60_v5  ;;  %p1685_p1 = scmp.ne.s32.totalorder %s1418_s7, %s1684_s8  ;;  %p1690_p3 = scmp.lt.s32.totalorder %s1684_s8, %s1684_s8 }
  0x2e   :  { %p1691_p4 = por %p1690_p3, %p1689_p2 }
  0x30   :  { %p1692_p5 = pnand %p1691_p4, %p1685_p1 }
  0xb1   :  { %v89_v6 = vpop.xlane.xlu0 %88 }
  0xb2   :  { %v65_v7 = vpop.xlane.xlu1 %64  ;;  %v90_v8 = vsub.f32 %v84_v0, %v89_v6 }
  0xb3   :  { %v67_v9 = vsub.f32 %v1757_v1, %v65_v7 }
  0xb4   :  { %v91_v10 = vmul.f32 1.442695, %v90_v8 }
  0xb5   :  { %v70_v11 = vmul.f32 1.442695, %v67_v9  ;;  %v62_v12 = vpop.xlane.xlu0 %61 }
  0xb6   :  { %1542 = vpow2.f32 %v91_v10  ;;  %v66_v13 = vsub.f32 %v1759_v2, %v62_v12 }
  0xb7   :  { %1544 = vpow2.f32 %v70_v11 }
  0xb8   :  { %v68_v14 = vmul.f32 1.442695, %v66_v13 }
  0xba   :  { %1546 = vpow2.f32 %v68_v14 }
  0xc3   :  { %v1543_v15 = vpop.eup %1542 }
  0xc4   :  { %v1545_v16 = vpop.eup %1544  ;;  %v93_v17 = vsel %vm86_vm0, %v1543_v15, 0.0 }
  0xc5   :  { %94 = vadd.xlane.f32.xlu1 %v93_v17  ;;  %v75_v18 = vsel %vm59_vm1, %v1545_v16, 0.0 }
  0xc7   :  { %v1547_v19 = vpop.eup %1546 }
  0xc8   :  { %v72_v20 = vsel %vm59_vm1, %v1547_v19, 0.0 }
  0xc9   :  { %76 = vadd.xlane.f32.xlu1 %v75_v18  ;;  %73 = vadd.xlane.f32.xlu0 %v72_v20 }
 0x14e   :  { %v95_v22 = vpop.xlane.xlu1 %94 }
 0x14f   :  { %1548 = vrcp.f32 %v95_v22 }
 0x152   :  { %v77_v23 = vpop.xlane.xlu1 %76  ;;  %v74_v24 = vpop.xlane.xlu0 %73 }
 0x153   :  { %1550 = vlog2.f32 %v77_v23 }
 0x154   :  { %1552 = vlog2.f32 %v74_v24 }
 0x155   :  { %1554 = vlog2.f32 %v98_v34 }
 0x15c   :  { %v1549_v25 = vpop.eup %1548 }
 0x15d   :  { %v97_v26 = vmul.f32 %v1549_v25, %v1543_v15 }
 0x15f   :  { %1473 = vmatpush3.xpose.msk.msra.mxu0 %vm59_vm1, %v97_v26  ;;  %1478 = vmatpush3.xpose.msk.msra.mxu1 %vm59_vm1, %v97_v26 }
 0x160   :  { %v1551_v27 = vpop.eup %1550  ;;  %1482 = vmatprep.subr.mxu0 %v1717_v21  ;;  %1487 = vmatprep.subr.mxu1 %v1717_v21 }
 0x161   :  { %v1553_v28 = vpop.eup %1552  ;;  %v81_v29 = vmul.f32 0.6931472, %v1551_v27 }
 0x162   :  { %v79_v30 = vmul.f32 0.6931472, %v1553_v28  ;;  %v1555_v37 = vpop.eup %1554 }
 0x163   :  { %v1781_v31 = vsub.f32 %v67_v9, %v81_v29  ;;  %v100_v38 = vmul.f32 0.6931472, %v1555_v37 }
 0x164   :  { %v1783_v32 = vsub.f32 %v66_v13, %v79_v30 }
 0x165   :  { %1480 = vmatmul.mubr.msk.f32.vlgmr.msra.gmra.mxu1 %vm59_vm1, %v1781_v31  ;;  %v105_v40 = vrot.slane %v100_v38, %v104_v39 }
 0x166   :  { %1475 = vmatmul.mubr.msk.f32.vlgmr.msra.gmra.mxu0 %vm59_vm1, %v1783_v32  ;;  %1488 = vmatpush3.msra.mxu1 %v1757_v1 }
 0x167   :  { %1483 = vmatpush3.msra.mxu0 %v1759_v2  ;;  %1489 = vmatprep.mubr.msk.f32.mxu1 %vm1718_vm2, %v1717_v21 }
 0x168   :  { %1484 = vmatprep.mubr.msk.f32.mxu0 %vm1718_vm2, %v1717_v21  ;;  %1492 = vmatprep.subr.mxu0 %v1717_v21 }
 0x169   :  { %1497 = vmatprep.subr.mxu1 %v1717_v21 }
 0x225   :  { %v252_v41 = vpop.f32.mrf.mxu1 }
 0x226   :  { %v179_v42 = vpop.f32.mrf.mxu0  ;;  %v253_v43 = vadd.f32 %v252_v41, %v105_v40 }
 0x227   :  { %v180_v44 = vadd.f32 %v179_v42, %v105_v40  ;;  %v1481_v45 = vpop.f32.mrf.mxu1 }
 0x228   :  { %v1476_v46 = vpop.f32.mrf.mxu0  ;;  %v260_v47 = vsel %vm256_vm3, %v253_v43, -inf }
 0x229   :  { %261 = vmax.xlane.f32.xlu1 %v260_v47  ;;  %v257_v48 = vsel %vm256_vm3, %v180_v44, -inf }
 0x22a   :  { %258 = vmax.xlane.f32.xlu0 %v257_v48 }
 0x2b2   :  { %v262_v49 = vpop.xlane.xlu1 %261 }
 0x2b3   :  { %v264_v50 = vsub.f32 %v253_v43, %v262_v49  ;;  %v259_v51 = vpop.xlane.xlu0 %258 }
 0x2b4   :  { %v263_v52 = vsub.f32 %v180_v44, %v259_v51 }
 0x2b5   :  { %v267_v53 = vmul.f32 1.442695, %v264_v50 }
 0x2b6   :  { %v265_v54 = vmul.f32 1.442695, %v263_v52 }
 0x2b7   :  { %1556 = vpow2.f32 %v267_v53 }
 0x2b8   :  { %1558 = vpow2.f32 %v265_v54 }
 0x2c4   :  { %v1557_v55 = vpop.eup %1556 }
 0x2c5   :  { %v1559_v56 = vpop.eup %1558  ;;  %v272_v57 = vsel %vm256_vm3, %v1557_v55, 0.0 }
 0x2c6   :  { %273 = vadd.xlane.f32.xlu1 %v272_v57  ;;  %v269_v58 = vsel %vm256_vm3, %v1559_v56, 0.0 }
 0x2c7   :  { %270 = vadd.xlane.f32.xlu0 %v269_v58 }
 0x34f   :  { %v274_v59 = vpop.xlane.xlu1 %273 }
 0x350   :  { %1560 = vrcp.f32 %v274_v59  ;;  %v271_v60 = vpop.xlane.xlu0 %270 }
 0x351   :  { %1562 = vrcp.f32 %v271_v60 }
 0x35d   :  { %v1561_v61 = vpop.eup %1560 }
 0x35e   :  { %v1563_v62 = vpop.eup %1562  ;;  %v278_v63 = vmul.f32 %v1561_v61, %v1557_v55 }
 0x35f   :  { %v277_v0 = vmul.f32 %v1563_v62, %v1559_v56 }
 0x360   :  { %401 = vxpose.xlu1.b32.start.end [1/1] (short) (narrow) %v278_v63, 8  ;;  %v286_v3 = vsel %vm256_vm3, %v278_v63, 0.0 }
 0x361   :  { %v287_v4 = vrot.slane %v286_v3, 4  ;;  %295 = vxpose.xlu0.b32.start.end [1/1] (short) (narrow) %v277_v0, 8  ;;  %v279_v5 = vsel %vm256_vm3, %v277_v0, 0.0 }
 0x362   :  { %v280_v6 = vrot.slane %v279_v5, 4 }
 0x363   :  { %v288_v7 = vadd.f32 %v287_v4, %v286_v3 }
 0x364   :  { %v281_v8 = vadd.f32 %v280_v6, %v279_v5 }
 0x365   :  { %v289_v9 = vrot.slane %v288_v7, 2 }
 0x366   :  { %v282_v11 = vrot.slane %v281_v8, 2 }
 0x367   :  { %v290_v10 = vadd.f32 %v289_v9, %v288_v7 }
 0x368   :  { %v283_v14 = vadd.f32 %v282_v11, %v281_v8 }
 0x369   :  { %v291_v12 = vrot.slane %v290_v10, 1 }
 0x36a   :  { %v284_v16 = vrot.slane %v283_v14, 1 }
 0x36b   :  { %v1806_v13 = vadd.f32 %v291_v12, %v290_v10 }
 0x36c   :  { %v285_v17 = vadd.f32 %v284_v16, %v283_v14 }
 0x36d   :  { %v507_v15 = vadd.f32 1e-08, %v1806_v13  ;;  %v294_v52 = vmul.f32 0.125, %v1806_v13 }
 0x36e   :  { %v506_v18 = vadd.f32 1e-08, %v285_v17  ;;  %v293_v53 = vmul.f32 0.125, %v285_v17 }
 0x36f   :  { %1564 = vrcp.f32 %v507_v15  ;;  %v541_v54 = vadd.f32 1e-08, %v294_v52 }
 0x370   :  { %1566 = vrcp.f32 %v506_v18  ;;  %v540_v55 = vadd.f32 1e-08, %v293_v53 }
 0x37c   :  { %v1565_v19 = vpop.eup %1564 }
 0x37d   :  { %v1567_v20 = vpop.eup %1566 }
 0x37e   :  { %514 = vbcast.lane.b32.xlu1 %v1565_v19, 256 }
 0x38a   :  { %511 = vbcast.lane.b32.xlu0 %v1567_v20, 256 }
 0x3dc   :  { %v417_v22 = vpop.trf.xlu1 }
 0x3dd   :  { %v311_v23 = vpop.trf.xlu0  ;;  %1490 = vmatmul.mubr.msk.f32.vlgmr.msra.gmra.mxu1 %vm327_vm4, %v417_v22 }
 0x3de   :  { %1485 = vmatmul.mubr.msk.f32.vlgmr.msra.gmra.mxu0 %vm327_vm4, %v311_v23  ;;  %1499 = vmatprep.mubr.msk.f32.mxu1 %vm1718_vm2, %v1717_v21 }
 0x3df   :  { %1494 = vmatprep.mubr.msk.f32.mxu0 %vm1718_vm2, %v1717_v21 }
 0x3f0   :  { %v515_v24 = vpop.permute.xlu1 %514 }
 0x3fc   :  { %v512_v26 = vpop.permute.xlu0 %511 }
 0x49d   :  { %v502_v25 = vpop.f32.mrf.mxu1 }
 0x49e   :  { %v397_v27 = vpop.f32.mrf.mxu0  ;;  %v517_v28 = vmul.f32 %v515_v24, %v502_v25 }
 0x49f   :  { %v516_v29 = vmul.f32 %v512_v26, %v397_v27  ;;  %v1491_v30 = vpop.f32.mrf.mxu1 }
 0x4a0   :  { %v1486_v33 = vpop.f32.mrf.mxu0  ;;  %v521_v34 = vsel %vm86_vm0, %v517_v28, -inf }
 0x4a1   :  { %522 = vmax.xlane.f32.xlu0 %v521_v34  ;;  %v518_v35 = vsel %vm86_vm0, %v516_v29, -inf }
 0x4a2   :  { %519 = vmax.xlane.f32.xlu1 %v518_v35 }
 0x52a   :  { %v523_v36 = vpop.xlane.xlu0 %522 }
 0x52b   :  { %v525_v37 = vsub.f32 %v517_v28, %v523_v36  ;;  %v520_v38 = vpop.xlane.xlu1 %519 }
 0x52c   :  { %v524_v39 = vsub.f32 %v516_v29, %v520_v38 }
 0x52d   :  { %v528_v40 = vmul.f32 1.442695, %v525_v37 }
 0x52e   :  { %v526_v41 = vmul.f32 1.442695, %v524_v39 }
 0x52f   :  { %1568 = vpow2.f32 %v528_v40 }
 0x530   :  { %1570 = vpow2.f32 %v526_v41 }
 0x53c   :  { %v1569_v42 = vpop.eup %1568 }
 0x53d   :  { %v1571_v43 = vpop.eup %1570  ;;  %v533_v44 = vsel %vm86_vm0, %v1569_v42, 0.0 }
 0x53e   :  { %534 = vadd.xlane.f32.xlu1 %v533_v44  ;;  %v530_v45 = vsel %vm86_vm0, %v1571_v43, 0.0 }
 0x53f   :  { %531 = vadd.xlane.f32.xlu0 %v530_v45 }
 0x5c7   :  { %v535_v46 = vpop.xlane.xlu1 %534 }
 0x5c8   :  { %v532_v47 = vpop.xlane.xlu0 %531  ;;  %1572 = vrcp.f32 %v535_v46 }
 0x5c9   :  { %1574 = vrcp.f32 %v532_v47 }
 0x5ca   :  { %1576 = vlog2.f32 %v541_v54 }
 0x5cb   :  { %1578 = vlog2.f32 %v540_v55 }
 0x5d5   :  { %v1573_v48 = vpop.eup %1572 }
 0x5d6   :  { %v1575_v49 = vpop.eup %1574  ;;  %v539_v50 = vmul.f32 %v1573_v48, %v1569_v42 }
 0x5d7   :  { %v538_v51 = vmul.f32 %v1575_v49, %v1571_v43  ;;  %v1577_v56 = vpop.eup %1576 }
 0x5d8   :  { %1498 = vmatpush3.xpose.msk.msra.mxu1 %vm59_vm1, %v539_v50  ;;  %v1579_v57 = vpop.eup %1578  ;;  %v545_v58 = vmul.f32 0.6931472, %v1577_v56 }
 0x5d9   :  { %1493 = vmatpush3.xpose.msk.msra.mxu0 %vm59_vm1, %v538_v51  ;;  %1507 = vmatprep.subr.mxu1 %v1717_v21  ;;  %v543_v59 = vmul.f32 0.6931472, %v1579_v57 }
 0x5da   :  { %1502 = vmatprep.subr.mxu0 %v1717_v21 }
 0x5db   :  { %1500 = vmatmul.mubr.msk.f32.vlgmr.msra.gmra.mxu1 %vm59_vm1, %v1781_v31 }
 0x5dc   :  { %1495 = vmatmul.mubr.msk.f32.vlgmr.msra.gmra.mxu0 %vm59_vm1, %v1783_v32  ;;  %1508 = vmatpush3.msra.mxu1 %v1757_v1 }
 0x5dd   :  { %1503 = vmatpush3.msra.mxu0 %v1759_v2  ;;  %1504 = vmatprep.mubr.msk.f32.mxu0 %vm1718_vm2, %v1717_v21 }
 0x5de   :  { %1509 = vmatprep.mubr.msk.f32.mxu1 %vm1718_vm2, %v1717_v21  ;;  %1512 = vmatprep.subr.mxu0 %v1717_v21 }
 0x5df   :  { %1517 = vmatprep.subr.mxu1 %v1717_v21 }
 0x69b   :  { %v688_v60 = vpop.f32.mrf.mxu1 }
 0x69c   :  { %v615_v61 = vpop.f32.mrf.mxu0  ;;  %v689_v62 = vadd.f32 %v688_v60, %v545_v58 }
 0x69d   :  { %v616_v63 = vadd.f32 %v615_v61, %v543_v59  ;;  %v1501_v0 = vpop.f32.mrf.mxu1 }
 0x69e   :  { %v1496_v3 = vpop.f32.mrf.mxu0  ;;  %v695_v4 = vsel %vm256_vm3, %v689_v62, -inf }
 0x69f   :  { %696 = vmax.xlane.f32.xlu1 %v695_v4  ;;  %v692_v5 = vsel %vm256_vm3, %v616_v63, -inf }
 0x6a0   :  { %693 = vmax.xlane.f32.xlu0 %v692_v5 }
 0x728   :  { %v697_v6 = vpop.xlane.xlu1 %696 }
 0x729   :  { %v699_v7 = vsub.f32 %v689_v62, %v697_v6  ;;  %v694_v8 = vpop.xlane.xlu0 %693 }
 0x72a   :  { %v698_v9 = vsub.f32 %v616_v63, %v694_v8 }
 0x72b   :  { %v702_v10 = vmul.f32 1.442695, %v699_v7 }
 0x72c   :  { %v700_v11 = vmul.f32 1.442695, %v698_v9 }
 0x72d   :  { %1580 = vpow2.f32 %v702_v10 }
 0x72e   :  { %1582 = vpow2.f32 %v700_v11 }
 0x73a   :  { %v1581_v12 = vpop.eup %1580 }
 0x73b   :  { %v1583_v13 = vpop.eup %1582  ;;  %v707_v14 = vsel %vm256_vm3, %v1581_v12, 0.0 }
 0x73c   :  { %708 = vadd.xlane.f32.xlu1 %v707_v14  ;;  %v704_v15 = vsel %vm256_vm3, %v1583_v13, 0.0 }
 0x73d   :  { %705 = vadd.xlane.f32.xlu0 %v704_v15 }
 0x7c5   :  { %v709_v16 = vpop.xlane.xlu1 %708 }
 0x7c6   :  { %1584 = vrcp.f32 %v709_v16  ;;  %v706_v17 = vpop.xlane.xlu0 %705 }
 0x7c7   :  { %1586 = vrcp.f32 %v706_v17 }
 0x7d3   :  { %v1585_v18 = vpop.eup %1584 }
 0x7d4   :  { %v1587_v19 = vpop.eup %1586  ;;  %v713_v20 = vmul.f32 %v1585_v18, %v1581_v12 }
 0x7d5   :  { %v712_v22 = vmul.f32 %v1587_v19, %v1583_v13 }
 0x7d6   :  { %835 = vxpose.xlu1.b32.start.end [1/1] (short) (narrow) %v713_v20, 8  ;;  %v721_v23 = vsel %vm256_vm3, %v713_v20, 0.0 }
 0x7d7   :  { %v722_v24 = vrot.slane %v721_v23, 4  ;;  %730 = vxpose.xlu0.b32.start.end [1/1] (short) (narrow) %v712_v22, 8  ;;  %v714_v25 = vsel %vm256_vm3, %v712_v22, 0.0 }
 0x7d8   :  { %v715_v26 = vrot.slane %v714_v25, 4 }
 0x7d9   :  { %v723_v27 = vadd.f32 %v722_v24, %v721_v23 }
 0x7da   :  { %v716_v28 = vadd.f32 %v715_v26, %v714_v25 }
 0x7db   :  { %v724_v29 = vrot.slane %v723_v27, 2 }
 0x7dc   :  { %v717_v33 = vrot.slane %v716_v28, 2 }
 0x7dd   :  { %v725_v30 = vadd.f32 %v724_v29, %v723_v27 }
 0x7de   :  { %v718_v36 = vadd.f32 %v717_v33, %v716_v28 }
 0x7df   :  { %v726_v34 = vrot.slane %v725_v30, 1 }
 0x7e0   :  { %v719_v38 = vrot.slane %v718_v36, 1 }
 0x7e1   :  { %v727_v35 = vadd.f32 %v726_v34, %v725_v30 }
 0x7e2   :  { %v720_v39 = vadd.f32 %v719_v38, %v718_v36 }
 0x7e3   :  { %v941_v37 = vadd.f32 1e-08, %v727_v35  ;;  %v729_v9 = vmul.f32 0.125, %v727_v35 }
 0x7e4   :  { %v940_v40 = vadd.f32 1e-08, %v720_v39  ;;  %v728_v10 = vmul.f32 0.125, %v720_v39 }
 0x7e5   :  { %1588 = vrcp.f32 %v941_v37  ;;  %v975_v11 = vadd.f32 1e-08, %v729_v9 }
 0x7e6   :  { %1590 = vrcp.f32 %v940_v40  ;;  %v974_v12 = vadd.f32 1e-08, %v728_v10 }
 0x7f2   :  { %v1589_v41 = vpop.eup %1588 }
 0x7f3   :  { %v1591_v42 = vpop.eup %1590 }
 0x7f4   :  { %948 = vbcast.lane.b32.xlu1 %v1589_v41, 256 }
 0x800   :  { %945 = vbcast.lane.b32.xlu0 %v1591_v42, 256 }
 0x852   :  { %v851_v43 = vpop.trf.xlu1 }
 0x853   :  { %v746_v44 = vpop.trf.xlu0  ;;  %1510 = vmatmul.mubr.msk.f32.vlgmr.msra.gmra.mxu1 %vm327_vm4, %v851_v43 }
 0x854   :  { %1505 = vmatmul.mubr.msk.f32.vlgmr.msra.gmra.mxu0 %vm327_vm4, %v746_v44  ;;  %1519 = vmatprep.mubr.msk.f32.mxu1 %vm1718_vm2, %v1717_v21 }
 0x855   :  { %1514 = vmatprep.mubr.msk.f32.mxu0 %vm1718_vm2, %v1717_v21 }
 0x866   :  { %v949_v45 = vpop.permute.xlu1 %948 }
 0x872   :  { %v946_v47 = vpop.permute.xlu0 %945 }
 0x913   :  { %v936_v46 = vpop.f32.mrf.mxu1 }
 0x914   :  { %v831_v48 = vpop.f32.mrf.mxu0  ;;  %v951_v49 = vmul.f32 %v949_v45, %v936_v46 }
 0x915   :  { %v950_v50 = vmul.f32 %v946_v47, %v831_v48  ;;  %v1511_v51 = vpop.f32.mrf.mxu1 }
 0x916   :  { %v1506_v52 = vpop.f32.mrf.mxu0  ;;  %v955_v53 = vsel %vm86_vm0, %v951_v49, -inf }
 0x917   :  { %956 = vmax.xlane.f32.xlu0 %v955_v53  ;;  %v952_v54 = vsel %vm86_vm0, %v950_v50, -inf }
 0x918   :  { %953 = vmax.xlane.f32.xlu1 %v952_v54 }
 0x9a0   :  { %v957_v55 = vpop.xlane.xlu0 %956 }
 0x9a1   :  { %v959_v56 = vsub.f32 %v951_v49, %v957_v55  ;;  %v954_v57 = vpop.xlane.xlu1 %953 }
 0x9a2   :  { %v958_v58 = vsub.f32 %v950_v50, %v954_v57 }
 0x9a3   :  { %v962_v59 = vmul.f32 1.442695, %v959_v56 }
 0x9a4   :  { %v960_v60 = vmul.f32 1.442695, %v958_v58 }
 0x9a5   :  { %1592 = vpow2.f32 %v962_v59 }
 0x9a6   :  { %1594 = vpow2.f32 %v960_v60 }
 0x9b2   :  { %v1593_v61 = vpop.eup %1592 }
 0x9b3   :  { %v1595_v62 = vpop.eup %1594  ;;  %v967_v63 = vsel %vm86_vm0, %v1593_v61, 0.0 }
 0x9b4   :  { %968 = vadd.xlane.f32.xlu1 %v967_v63  ;;  %v964_v0 = vsel %vm86_vm0, %v1595_v62, 0.0 }
 0x9b5   :  { %965 = vadd.xlane.f32.xlu0 %v964_v0 }
 0xa3d   :  { %v969_v3 = vpop.xlane.xlu1 %968 }
 0xa3e   :  { %v966_v4 = vpop.xlane.xlu0 %965  ;;  %1596 = vrcp.f32 %v969_v3  ;;  %v1384_v3 = vld [vmem:[#allocation7] sm:$0xf] }
 0xa3f   :  { %1598 = vrcp.f32 %v966_v4 }
 0xa40   :  { %1600 = vlog2.f32 %v975_v11 }
 0xa41   :  { %1602 = vlog2.f32 %v974_v12 }
 0xa4b   :  { %v1597_v5 = vpop.eup %1596 }
 0xa4c   :  { %v1599_v6 = vpop.eup %1598  ;;  %v973_v7 = vmul.f32 %v1597_v5, %v1593_v61  ;;  %v1385_v61 = vld [vmem:[#allocation7 + $0x4] sm:$0xf] }
 0xa4d   :  { %v972_v8 = vmul.f32 %v1599_v6, %v1595_v62 }
 0xa4e   :  { %1518 = vmatpush3.xpose.msk.msra.mxu1 %vm59_vm1, %v973_v7 }
 0xa4f   :  { %1513 = vmatpush3.xpose.msk.msra.mxu0 %vm59_vm1, %v972_v8  ;;  %1527 = vmatprep.subr.mxu1 %v1717_v21 }
 0xa50   :  { %1522 = vmatprep.subr.mxu0 %v1717_v21 }
 0xa51   :  { %1520 = vmatmul.mubr.msk.f32.vlgmr.msra.gmra.mxu1 %vm59_vm1, %v1781_v31  ;;  %v1601_v31 = vpop.eup %1600 }
 0xa52   :  { %1515 = vmatmul.mubr.msk.f32.vlgmr.msra.gmra.mxu0 %vm59_vm1, %v1783_v32  ;;  %1528 = vmatpush3.msra.mxu1 %v1757_v1  ;;  %v1603_v13 = vpop.eup %1602  ;;  %v979_v14 = vmul.f32 0.6931472, %v1601_v31 }
 0xa53   :  { %1523 = vmatpush3.msra.mxu0 %v1759_v2  ;;  %1524 = vmatprep.mubr.msk.f32.mxu0 %vm1718_vm2, %v1717_v21  ;;  %v977_v32 = vmul.f32 0.6931472, %v1603_v13 }
 0xa54   :  { %1529 = vmatprep.mubr.msk.f32.mxu1 %vm1718_vm2, %v1717_v21 }
 0xb11   :  { %v1122_v15 = vpop.f32.mrf.mxu1 }
 0xb12   :  { %v1049_v1 = vpop.f32.mrf.mxu0  ;;  %v1123_v16 = vadd.f32 %v1122_v15, %v979_v14 }
 0xb13   :  { %v1050_v2 = vadd.f32 %v1049_v1, %v977_v32  ;;  %v1521_v17 = vpop.f32.mrf.mxu1 }
 0xb14   :  { %v1516_v18 = vpop.f32.mrf.mxu0  ;;  %v1129_v19 = vsel %vm256_vm3, %v1123_v16, -inf }
 0xb15   :  { %1130 = vmax.xlane.f32.xlu1 %v1129_v19  ;;  %v1126_v21 = vsel %vm256_vm3, %v1050_v2, -inf }
 0xb16   :  { %1127 = vmax.xlane.f32.xlu0 %v1126_v21 }
 0xb9e   :  { %v1131_v20 = vpop.xlane.xlu1 %1130 }
 0xb9f   :  { %v1133_v22 = vsub.f32 %v1123_v16, %v1131_v20  ;;  %v1128_v23 = vpop.xlane.xlu0 %1127 }
 0xba0   :  { %v1132_v24 = vsub.f32 %v1050_v2, %v1128_v23 }
 0xba1   :  { %v1136_v25 = vmul.f32 1.442695, %v1133_v22 }
 0xba2   :  { %v1134_v26 = vmul.f32 1.442695, %v1132_v24 }
 0xba3   :  { %1604 = vpow2.f32 %v1136_v25 }
 0xba4   :  { %1606 = vpow2.f32 %v1134_v26 }
 0xbb0   :  { %v1605_v27 = vpop.eup %1604 }
 0xbb1   :  { %v1607_v28 = vpop.eup %1606  ;;  %v1141_v29 = vsel %vm256_vm3, %v1605_v27, 0.0 }
 0xbb2   :  { %1142 = vadd.xlane.f32.xlu1 %v1141_v29  ;;  %v1138_v30 = vsel %vm256_vm3, %v1607_v28, 0.0 }
 0xbb3   :  { %1139 = vadd.xlane.f32.xlu0 %v1138_v30 }
 0xc3b   :  { %v1143_v33 = vpop.xlane.xlu1 %1142 }
 0xc3c   :  { %1608 = vrcp.f32 %v1143_v33  ;;  %v1140_v34 = vpop.xlane.xlu0 %1139 }
 0xc3d   :  { %1610 = vrcp.f32 %v1140_v34 }
 0xc49   :  { %v1609_v35 = vpop.eup %1608 }
 0xc4a   :  { %v1611_v36 = vpop.eup %1610  ;;  %v1147_v37 = vmul.f32 %v1609_v35, %v1605_v27 }
 0xc4b   :  { %v1146_v38 = vmul.f32 %v1611_v36, %v1607_v28 }
 0xc4c   :  { %1267 = vxpose.xlu1.b32.start.end [1/1] (short) (narrow) %v1147_v37, 8  ;;  %v1155_v39 = vsel %vm256_vm3, %v1147_v37, 0.0 }
 0xc4d   :  { %v1156_v40 = vrot.slane %v1155_v39, 4  ;;  %1162 = vxpose.xlu0.b32.start.end [1/1] (short) (narrow) %v1146_v38, 8  ;;  %v1148_v41 = vsel %vm256_vm3, %v1146_v38, 0.0 }
 0xc4e   :  { %v1149_v42 = vrot.slane %v1148_v41, 4 }
 0xc4f   :  { %v1157_v43 = vadd.f32 %v1156_v40, %v1155_v39 }
 0xc50   :  { %v1150_v44 = vadd.f32 %v1149_v42, %v1148_v41 }
 0xc51   :  { %v1158_v45 = vrot.slane %v1157_v43, 2 }
 0xc52   :  { %v1151_v47 = vrot.slane %v1150_v44, 2 }
 0xc53   :  { %v1159_v46 = vadd.f32 %v1158_v45, %v1157_v43 }
 0xc54   :  { %v1152_v50 = vadd.f32 %v1151_v47, %v1150_v44 }
 0xc55   :  { %v1160_v48 = vrot.slane %v1159_v46, 1 }
 0xc56   :  { %v1153_v52 = vrot.slane %v1152_v50, 1 }
 0xc57   :  { %v1161_v49 = vadd.f32 %v1160_v48, %v1159_v46 }
 0xc58   :  { %v1154_v53 = vadd.f32 %v1153_v52, %v1152_v50 }
 0xc59   :  { %v1373_v51 = vadd.f32 1e-08, %v1161_v49 }
 0xc5a   :  { %v1372_v54 = vadd.f32 1e-08, %v1154_v53 }
 0xc5b   :  { %1612 = vrcp.f32 %v1373_v51 }
 0xc5c   :  { %1614 = vrcp.f32 %v1372_v54 }
 0xc68   :  { %v1613_v55 = vpop.eup %1612 }
 0xc69   :  { %v1615_v56 = vpop.eup %1614 }
 0xc6a   :  { %1380 = vbcast.lane.b32.xlu1 %v1613_v55, 256 }
 0xc76   :  { %1377 = vbcast.lane.b32.xlu0 %v1615_v56, 256 }
 0xcc8   :  { %v1283_v57 = vpop.trf.xlu1 }
 0xcc9   :  { %v1178_v58 = vpop.trf.xlu0  ;;  %1530 = vmatmul.mubr.msk.f32.vlgmr.msra.gmra.mxu1 %vm327_vm4, %v1283_v57 }
 0xcca   :  { %1525 = vmatmul.mubr.msk.f32.vlgmr.msra.gmra.mxu0 %vm327_vm4, %v1178_v58 }
 0xcdc   :  { %v1381_v59 = vpop.permute.xlu1 %1380 }
 0xce8   :  { %v1378_v62 = vpop.permute.xlu0 %1377 }
 0xd89   :  { %v1368_v60 = vpop.f32.mrf.mxu1 }
 0xd8a   :  { %v1263_v63 = vpop.f32.mrf.mxu0  ;;  %v1383_v0 = vmul.f32 %v1381_v59, %v1368_v60 }
 0xd8b   :  { %v1382_v4 = vmul.f32 %v1378_v62, %v1263_v63  ;;  %v1531_v5 = vpop.f32.mrf.mxu1 }
 0xd8c   :  { %v1526_v6 = vpop.f32.mrf.mxu0  ;;  %v1387_v7 = vadd.f32 %v1385_v61, %v1383_v0 }
 0xd8d   :  { %v1386_v8 = vadd.f32 %v1384_v3, %v1382_v4 }
 0xd8e   :  { %v1391_v9 = vsel %vm86_vm0, %v1387_v7, -inf }
 0xd8f   :  { %1392 = vmax.xlane.f32.xlu0 %v1391_v9  ;;  %v1388_v10 = vsel %vm86_vm0, %v1386_v8, -inf }
 0xd90   :  { %1389 = vmax.xlane.f32.xlu1 %v1388_v10 }
 0xe18   :  { %v1393_v11 = vpop.xlane.xlu0 %1392 }
 0xe19   :  { %v1395_v12 = vsub.f32 %v1387_v7, %v1393_v11  ;;  %v1390_v31 = vpop.xlane.xlu1 %1389 }
 0xe1a   :  { %v1394_v13 = vsub.f32 %v1386_v8, %v1390_v31 }
 0xe1b   :  { %v1398_v14 = vmul.f32 1.442695, %v1395_v12 }
 0xe1c   :  { %v1396_v32 = vmul.f32 1.442695, %v1394_v13 }
 0xe1d   :  { %1616 = vpow2.f32 %v1398_v14 }
 0xe1e   :  { %1618 = vpow2.f32 %v1396_v32 }
 0xe2a   :  { %v1617_v15 = vpop.eup %1616 }
 0xe2b   :  { %v1619_v1 = vpop.eup %1618  ;;  %v1403_v16 = vsel %vm86_vm0, %v1617_v15, 0.0 }
 0xe2c   :  { %1404 = vadd.xlane.f32.xlu1 %v1403_v16  ;;  %v1400_v2 = vsel %vm86_vm0, %v1619_v1, 0.0 }
 0xe2d   :  { %1401 = vadd.xlane.f32.xlu0 %v1400_v2 }
 0xeb5   :  { %v1405_v17 = vpop.xlane.xlu1 %1404 }
 0xeb6   :  { %v1402_v18 = vpop.xlane.xlu0 %1401  ;;  %1620 = vrcp.f32 %v1405_v17 }
 0xeb7   :  { %1622 = vrcp.f32 %v1402_v18 }
 0xec3   :  { %v1621_v19 = vpop.eup %1620 }
 0xec4   :  { %v1623_v21 = vpop.eup %1622  ;;  %v1409_v20 = vmul.f32 %v1621_v19, %v1617_v15 }
 0xec5   :  { %v1408_v22 = vmul.f32 %v1623_v21, %v1619_v1 }
 0xec6   :  { %1411 = vst.msk [vmem:[#allocation8 + $0x4] sm:$0xf] %vm86_vm0, %v1409_v20 }
 0xec7   :  { %1410 = vst.msk [vmem:[#allocation8] sm:$0xf] %vm86_vm0, %v1408_v22 }
 0xec8   :  { %1695 = shalt.err (!%p1692_p5)
}
 0xec9   :  { %1423 = dma.vmem_to_hbm [thread:$0]  %s1418_s7, 128, %s1890_s4, [#allocation4], %s1715_s1, %s1715_s1, %s1716_s30  }
 0xeca   :  { %1708 = dma.done.wait [#allocation4], 128  }
 0xecb   :  { %1709 = vsyncadd [#allocation4], 4294967168 }
 0xecc   :  { %1427 = vsyncpa [#allocation3], 1 }
 0xecd   :  { %1428 = vsyncpa [#allocation6], 1 }
 0xece   :  { %1429 = vsyncpa [#allocation4], 1 }

</bundles_post_ra>
